<compile_context>
chip_gen: v7x
topology: tpu7x:2x2x1
jax: 0.10.0
libtpu: 0.0.40
codegen_flags: <defaults>
</compile_context>

<pallas_src>
import functools

import jax
import jax.numpy as jnp
from jax.experimental import pallas as pl
from jax.experimental.pallas import tpu as pltpu


def _simam_kernel(masks_ref, x_ref, o_ref, *, four_inv_n, four_e_lambda):
    # masks_ref: (8, HW) f32 host constants
    #   row 0..3 : quadrant membership masks (top-left, top-right, bot-left, bot-right)
    #   row 4    : top-half mask, row 5: left-half mask (select predicates)
    #   row 6    : per-element 1/|quadrant| map, row 7: padding (zeros)
    # x_ref / o_ref: (TM, HW) tile of the flattened (B*C, H*W) tensor.
    m = masks_ref[...]
    m00, m01, m10, m11 = m[0:1], m[1:2], m[2:3], m[3:4]
    top = m[4:5] > 0.5
    left = m[5:6] > 0.5
    inv_size = m[6:7]                                     # (1, HW)

    x = x_ref[...].astype(jnp.float32)                    # (TM, HW)

    def qsum(v, mask):
        # Per-row sum of v restricted to one quadrant (reduction -> XLU).
        return jnp.sum(v * mask, axis=-1, keepdims=True)  # (TM, 1)

    # ---- pass 1: per-quadrant Σx -> per-element mean of its own quadrant ----
    s00, s01, s10, s11 = (qsum(x, m00), qsum(x, m01), qsum(x, m10), qsum(x, m11))
    s_own = jnp.where(top, jnp.where(left, s00, s01),
                      jnp.where(left, s10, s11))          # (TM, HW) via broadcast
    mu = s_own * inv_size                                 # mean of element's quadrant

    # ---- pass 2: per-quadrant Σ(x-μ)² (same formula as the PyTorch code) ----
    d = x - mu
    d2 = d * d
    v00, v01, v10, v11 = (qsum(d2, m00), qsum(d2, m01), qsum(d2, m10), qsum(d2, m11))
    v_own = jnp.where(top, jnp.where(left, v00, v01),
                      jnp.where(left, v10, v11))          # (TM, HW)

    # den = 4 * (Σ(x-μ)² / n + eλ); one full-tile divide instead of 4 per-row ones.
    den = v_own * four_inv_n + four_e_lambda
    y = d2 / den + 0.5
    o_ref[...] = (x * jax.nn.sigmoid(y)).astype(o_ref.dtype)


def simam_with_slicing(x: jax.Array, e_lambda: float = 1e-4) -> jax.Array:
    """Pallas TPU implementation of SimAMWithSlicing.forward (NCHW in/out)."""
    B, C, H, W = x.shape
    bh, bw = H // 2, W // 2
    n = bh * bw - 1
    inv_n = (1.0 / n) if n > 0 else float("inf")   # matches PyTorch div-by-zero case

    BC, HW = B * C, H * W
    x2d = x.reshape(BC, HW)                        # contiguous regroup: no HBM copy

    # Host-built quadrant constants over the flattened (row-major) spatial axis.
    idx = jnp.arange(HW, dtype=jnp.int32)
    r, c = idx // W, idx % W
    top_b, left_b = r < bh, c < bw
    m00 = (top_b & left_b).astype(jnp.float32)
    m01 = (top_b & ~left_b).astype(jnp.float32)
    m10 = (~top_b & left_b).astype(jnp.float32)
    m11 = (~top_b & ~left_b).astype(jnp.float32)
    sizes = jnp.array([bh * bw, bh * (W - bw), (H - bh) * bw, (H - bh) * (W - bw)],
                      dtype=jnp.float32)
    inv_sizes = jnp.where(sizes > 0, 1.0 / jnp.maximum(sizes, 1.0), 0.0)
    inv_size_map = (m00 * inv_sizes[0] + m01 * inv_sizes[1]
                    + m10 * inv_sizes[2] + m11 * inv_sizes[3])
    masks = jnp.stack([m00, m01, m10, m11,
                       top_b.astype(jnp.float32), left_b.astype(jnp.float32),
                       inv_size_map, jnp.zeros((HW,), jnp.float32)], axis=0)  # (8, HW)

    # ~2 MiB of f32 per x block: in+out double buffers stay far inside the
    # default scoped-VMEM limit on v5e/v6e/v7x while saturating HBM.
    tm = max(8, (((1 << 19) // max(HW, 1)) // 8) * 8)
    tm = min(tm, BC)                               # multiple of 8 or the full dim
    grid = (pl.cdiv(BC, tm),)

    kernel = functools.partial(_simam_kernel,
                               four_inv_n=float(4.0 * inv_n),
                               four_e_lambda=float(4.0 * e_lambda))

    out = pl.pallas_call(
        kernel,
        out_shape=jax.ShapeDtypeStruct((BC, HW), x.dtype),
        grid_spec=pltpu.PrefetchScalarGridSpec(
            num_scalar_prefetch=0,
            grid=grid,
            in_specs=[
                pl.BlockSpec((8, HW), lambda i: (0, 0)),    # constants, fetched once
                pl.BlockSpec((tm, HW), lambda i: (i, 0)),   # x tile
            ],
            out_specs=pl.BlockSpec((tm, HW), lambda i: (i, 0)),
        ),
        compiler_params=pltpu.CompilerParams(
            dimension_semantics=("parallel",)),
    )(masks, x2d)

    return out.reshape(B, C, H, W)


def _simam_reference(x: jax.Array, e_lambda: float = 1e-4) -> jax.Array:
    """Plain-JAX reference mirroring the PyTorch forward, for verification."""
    B, C, H, W = x.shape
    bh, bw = H // 2, W // 2
    n = bh * bw - 1
    blocks = [
        x[:, :, :bh, :bw], x[:, :, :bh, bw:],
        x[:, :, bh:, :bw], x[:, :, bh:, bw:],
    ]
    enhanced = []
    for blk in blocks:
        mu = jnp.mean(blk, axis=(2, 3), keepdims=True)
        sq = (blk - mu) ** 2
        y = sq / (4.0 * (jnp.sum(sq, axis=(2, 3), keepdims=True) / n + e_lambda)) + 0.5
        enhanced.append(blk * jax.nn.sigmoid(y))
    top = jnp.concatenate([enhanced[0], enhanced[1]], axis=3)
    bot = jnp.concatenate([enhanced[2], enhanced[3]], axis=3)
    return jnp.concatenate([top, bot], axis=2)


if __name__ == "__main__":
    key = jax.random.PRNGKey(0)
    B, C, H, W = 2, 4, 16, 16
    x = jax.random.normal(key, (B, C, H, W), dtype=jnp.float32)

    out = simam_with_slicing(x)
    out = jax.block_until_ready(out)

    ref = _simam_reference(x)
    assert out.shape == (B, C, H, W)
    assert jnp.allclose(out, ref, atol=1e-5, rtol=1e-5), "mismatch vs reference"

    print("KERNEL_OK")
</pallas_src>

<mosaic_0001>
module attributes {stable_mosaic.version = 11 : i64} {
  func.func @_simam_kernel(%arg0: i32, %arg1: memref<8x256xf32, #tpu.memory_space<vmem>>, %arg2: memref<8x256xf32, #tpu.memory_space<vmem>>, %arg3: memref<8x256xf32, #tpu.memory_space<vmem>>) attributes {dimension_semantics = [#tpu.dimension_semantics<parallel>], iteration_bounds = array<i64: 1>, scalar_prefetch = 0 : i64, scratch_operands = 0 : i64, tpu.core_type = #tpu.core_type<tc>, window_params = [{pipeline_mode = #tpu.pipeline_mode<synchronous>, transform_indices = @transform_0, window_bounds = array<i64: 8, 256>}, {transform_indices = @transform_1, window_bounds = array<i64: 8, 256>}, {transform_indices = @transform_2, window_bounds = array<i64: 8, 256>}]} {
    %c0 = arith.constant 0 : index
    %c0_0 = arith.constant 0 : index
    %0 = vector.load %arg1[%c0, %c0_0] : memref<8x256xf32, #tpu.memory_space<vmem>>, vector<8x256xf32>
    %1 = vector.extract_strided_slice %0 {offsets = [0, 0], sizes = [1, 256], strides = [1, 1]} : vector<8x256xf32> to vector<1x256xf32>
    %2 = vector.extract_strided_slice %0 {offsets = [1, 0], sizes = [1, 256], strides = [1, 1]} : vector<8x256xf32> to vector<1x256xf32>
    %3 = vector.extract_strided_slice %0 {offsets = [2, 0], sizes = [1, 256], strides = [1, 1]} : vector<8x256xf32> to vector<1x256xf32>
    %4 = vector.extract_strided_slice %0 {offsets = [3, 0], sizes = [1, 256], strides = [1, 1]} : vector<8x256xf32> to vector<1x256xf32>
    %5 = vector.extract_strided_slice %0 {offsets = [4, 0], sizes = [1, 256], strides = [1, 1]} : vector<8x256xf32> to vector<1x256xf32>
    %cst = arith.constant 5.000000e-01 : f32
    %6 = vector.broadcast %cst : f32 to vector<1x256xf32>
    %7 = arith.cmpf ogt, %5, %6 : vector<1x256xf32>
    %8 = vector.extract_strided_slice %0 {offsets = [5, 0], sizes = [1, 256], strides = [1, 1]} : vector<8x256xf32> to vector<1x256xf32>
    %cst_1 = arith.constant 5.000000e-01 : f32
    %9 = vector.broadcast %cst_1 : f32 to vector<1x256xf32>
    %10 = arith.cmpf ogt, %8, %9 : vector<1x256xf32>
    %11 = vector.extract_strided_slice %0 {offsets = [6, 0], sizes = [1, 256], strides = [1, 1]} : vector<8x256xf32> to vector<1x256xf32>
    %c0_2 = arith.constant 0 : index
    %c0_3 = arith.constant 0 : index
    %12 = vector.load %arg2[%c0_2, %c0_3] : memref<8x256xf32, #tpu.memory_space<vmem>>, vector<8x256xf32>
    %13 = vector.broadcast %1 : vector<1x256xf32> to vector<8x256xf32>
    %14 = arith.mulf %12, %13 : vector<8x256xf32>
    %cst_4 = arith.constant dense<0.000000e+00> : vector<8xf32>
    %15 = vector.multi_reduction <add>, %14, %cst_4 [1] : vector<8x256xf32> to vector<8xf32>
    %16 = vector.shape_cast %15 : vector<8xf32> to vector<8x1xf32>
    %17 = vector.broadcast %2 : vector<1x256xf32> to vector<8x256xf32>
    %18 = arith.mulf %12, %17 : vector<8x256xf32>
    %cst_5 = arith.constant dense<0.000000e+00> : vector<8xf32>
    %19 = vector.multi_reduction <add>, %18, %cst_5 [1] : vector<8x256xf32> to vector<8xf32>
    %20 = vector.shape_cast %19 : vector<8xf32> to vector<8x1xf32>
    %21 = vector.broadcast %3 : vector<1x256xf32> to vector<8x256xf32>
    %22 = arith.mulf %12, %21 : vector<8x256xf32>
    %cst_6 = arith.constant dense<0.000000e+00> : vector<8xf32>
    %23 = vector.multi_reduction <add>, %22, %cst_6 [1] : vector<8x256xf32> to vector<8xf32>
    %24 = vector.shape_cast %23 : vector<8xf32> to vector<8x1xf32>
    %25 = vector.broadcast %4 : vector<1x256xf32> to vector<8x256xf32>
    %26 = arith.mulf %12, %25 : vector<8x256xf32>
    %cst_7 = arith.constant dense<0.000000e+00> : vector<8xf32>
    %27 = vector.multi_reduction <add>, %26, %cst_7 [1] : vector<8x256xf32> to vector<8xf32>
    %28 = vector.shape_cast %27 : vector<8xf32> to vector<8x1xf32>
    %29 = vector.shape_cast %10 : vector<1x256xi1> to vector<1x256xi1>
    %30 = vector.broadcast %29 : vector<1x256xi1> to vector<8x256xi1>
    %31 = vector.shape_cast %16 : vector<8x1xf32> to vector<8x1xf32>
    %32 = vector.broadcast %31 : vector<8x1xf32> to vector<8x256xf32>
    %33 = vector.shape_cast %20 : vector<8x1xf32> to vector<8x1xf32>
    %34 = vector.broadcast %33 : vector<8x1xf32> to vector<8x256xf32>
    %35 = arith.select %30, %32, %34 : vector<8x256xi1>, vector<8x256xf32>
    %36 = vector.shape_cast %10 : vector<1x256xi1> to vector<1x256xi1>
    %37 = vector.broadcast %36 : vector<1x256xi1> to vector<8x256xi1>
    %38 = vector.shape_cast %24 : vector<8x1xf32> to vector<8x1xf32>
    %39 = vector.broadcast %38 : vector<8x1xf32> to vector<8x256xf32>
    %40 = vector.shape_cast %28 : vector<8x1xf32> to vector<8x1xf32>
    %41 = vector.broadcast %40 : vector<8x1xf32> to vector<8x256xf32>
    %42 = arith.select %37, %39, %41 : vector<8x256xi1>, vector<8x256xf32>
    %43 = vector.shape_cast %7 : vector<1x256xi1> to vector<1x256xi1>
    %44 = vector.broadcast %43 : vector<1x256xi1> to vector<8x256xi1>
    %45 = arith.select %44, %35, %42 : vector<8x256xi1>, vector<8x256xf32>
    %46 = vector.broadcast %11 : vector<1x256xf32> to vector<8x256xf32>
    %47 = arith.mulf %45, %46 : vector<8x256xf32>
    %48 = arith.subf %12, %47 : vector<8x256xf32>
    %49 = arith.mulf %48, %48 : vector<8x256xf32>
    %50 = vector.broadcast %1 : vector<1x256xf32> to vector<8x256xf32>
    %51 = arith.mulf %49, %50 : vector<8x256xf32>
    %cst_8 = arith.constant dense<0.000000e+00> : vector<8xf32>
    %52 = vector.multi_reduction <add>, %51, %cst_8 [1] : vector<8x256xf32> to vector<8xf32>
    %53 = vector.shape_cast %52 : vector<8xf32> to vector<8x1xf32>
    %54 = vector.broadcast %2 : vector<1x256xf32> to vector<8x256xf32>
    %55 = arith.mulf %49, %54 : vector<8x256xf32>
    %cst_9 = arith.constant dense<0.000000e+00> : vector<8xf32>
    %56 = vector.multi_reduction <add>, %55, %cst_9 [1] : vector<8x256xf32> to vector<8xf32>
    %57 = vector.shape_cast %56 : vector<8xf32> to vector<8x1xf32>
    %58 = vector.broadcast %3 : vector<1x256xf32> to vector<8x256xf32>
    %59 = arith.mulf %49, %58 : vector<8x256xf32>
    %cst_10 = arith.constant dense<0.000000e+00> : vector<8xf32>
    %60 = vector.multi_reduction <add>, %59, %cst_10 [1] : vector<8x256xf32> to vector<8xf32>
    %61 = vector.shape_cast %60 : vector<8xf32> to vector<8x1xf32>
    %62 = vector.broadcast %4 : vector<1x256xf32> to vector<8x256xf32>
    %63 = arith.mulf %49, %62 : vector<8x256xf32>
    %cst_11 = arith.constant dense<0.000000e+00> : vector<8xf32>
    %64 = vector.multi_reduction <add>, %63, %cst_11 [1] : vector<8x256xf32> to vector<8xf32>
    %65 = vector.shape_cast %64 : vector<8xf32> to vector<8x1xf32>
    %66 = vector.shape_cast %10 : vector<1x256xi1> to vector<1x256xi1>
    %67 = vector.broadcast %66 : vector<1x256xi1> to vector<8x256xi1>
    %68 = vector.shape_cast %53 : vector<8x1xf32> to vector<8x1xf32>
    %69 = vector.broadcast %68 : vector<8x1xf32> to vector<8x256xf32>
    %70 = vector.shape_cast %57 : vector<8x1xf32> to vector<8x1xf32>
    %71 = vector.broadcast %70 : vector<8x1xf32> to vector<8x256xf32>
    %72 = arith.select %67, %69, %71 : vector<8x256xi1>, vector<8x256xf32>
    %73 = vector.shape_cast %10 : vector<1x256xi1> to vector<1x256xi1>
    %74 = vector.broadcast %73 : vector<1x256xi1> to vector<8x256xi1>
    %75 = vector.shape_cast %61 : vector<8x1xf32> to vector<8x1xf32>
    %76 = vector.broadcast %75 : vector<8x1xf32> to vector<8x256xf32>
    %77 = vector.shape_cast %65 : vector<8x1xf32> to vector<8x1xf32>
    %78 = vector.broadcast %77 : vector<8x1xf32> to vector<8x256xf32>
    %79 = arith.select %74, %76, %78 : vector<8x256xi1>, vector<8x256xf32>
    %80 = vector.shape_cast %7 : vector<1x256xi1> to vector<1x256xi1>
    %81 = vector.broadcast %80 : vector<1x256xi1> to vector<8x256xi1>
    %82 = arith.select %81, %72, %79 : vector<8x256xi1>, vector<8x256xf32>
    %cst_12 = arith.constant 0.0634920672 : f32
    %83 = vector.broadcast %cst_12 : f32 to vector<8x256xf32>
    %84 = arith.mulf %82, %83 : vector<8x256xf32>
    %cst_13 = arith.constant 4.000000e-04 : f32
    %85 = vector.broadcast %cst_13 : f32 to vector<8x256xf32>
    %86 = arith.addf %84, %85 : vector<8x256xf32>
    %87 = arith.divf %49, %86 : vector<8x256xf32>
    %cst_14 = arith.constant 5.000000e-01 : f32
    %88 = vector.broadcast %cst_14 : f32 to vector<8x256xf32>
    %89 = arith.addf %87, %88 : vector<8x256xf32>
    %90 = arith.negf %89 : vector<8x256xf32>
    %91 = math.exp %90 : vector<8x256xf32>
    %cst_15 = arith.constant 1.000000e+00 : f32
    %92 = vector.broadcast %cst_15 : f32 to vector<8x256xf32>
    %93 = arith.addf %92, %91 : vector<8x256xf32>
    %94 = arith.divf %92, %93 : vector<8x256xf32>
    %95 = arith.mulf %12, %94 : vector<8x256xf32>
    %c0_16 = arith.constant 0 : index
    %c0_17 = arith.constant 0 : index
    %96 = vector.load %arg3[%c0_16, %c0_17] : memref<8x256xf32, #tpu.memory_space<vmem>>, vector<8x256xf32>
    tpu.vector_store %arg3[%c0_16, %c0_17], %95 {strides = array<i32>} : memref<8x256xf32, #tpu.memory_space<vmem>>, vector<8x256xf32>,
    return
  }
  func.func @transform_0(%arg0: i32) -> (i32, i32) {
    %c0_i32 = arith.constant 0 : i32
    %c0_i32_0 = arith.constant 0 : i32
    %c0_i32_1 = arith.constant 0 : i32
    return %c0_i32, %c0_i32_0 : i32, i32
  }
  func.func @transform_1(%arg0: i32) -> (i32, i32) {
    %c0_i32 = arith.constant 0 : i32
    %c0_i32_0 = arith.constant 0 : i32
    return %arg0, %c0_i32 : i32, i32
  }
  func.func @transform_2(%arg0: i32) -> (i32, i32) {
    %c0_i32 = arith.constant 0 : i32
    %c0_i32_0 = arith.constant 0 : i32
    return %arg0, %c0_i32 : i32, i32
  }
}

</mosaic_0001>

<bundles_post_ra>
// kernel: tpu_custom_call.1
= control target key start
LH: loop header
LB: loop body
LE: loop exit
PB: predicated region body
PF: predicated region fallthrough
CT: control target
= control target key end

     0   :  { %7 = vsyncpa [#allocation3], 0  ;;  %s385_s0 = inlined_call_operand.hbm [shape: f32[8,256], index: 0, kind: input, shape index: {}]   ;;  %s386_s1 = inlined_call_operand.hbm [shape: f32[8,256], index: 1, kind: input, shape index: {}]   ;;  %s387_s2 = inlined_call_operand.hbm [shape: f32[8,256], index: 2, kind: output, shape index: {}]  }
   0x1   :  { %8 = vsyncpa [#allocation6], 0 }
   0x2   :  { %9 = vsyncpa [#allocation4], 0  ;;  %s294_s9 = smov [#allocation2]   ;;  %s295_s11 = smov [#allocation5]  }
   0x3   :  { %s16_s10 = sshll.u32 %s294_s9, 4  ;;  %s26_s12 = sshll.u32 %s295_s11, 4  ;;  %s17_s10 = int_to_ptr.vmem [resolvable:$true] %s16_s10  ;;  %s27_s12 = int_to_ptr.vmem [resolvable:$true] %s26_s12 }
   0x4   :  { %s222_s15 = scalar_lea.hbm %s385_s0, 256 }
   0x5   :  { %p223_p0 = scmp.ne.s32.totalorder %s385_s0, %s222_s15  ;;  %p226_p1 = scmp.lt.u32.totalorder %s222_s15, %s385_s0 }
   0x7   :  { %p228_p2 = pnand %p226_p1, %p223_p0 }
   0x9   :  { %231 = shalt.err (!%p228_p2)
}
   0xa   :  { %s232_s20 = scalar_lea.vmem %s17_s10, 256  ;;  %p237_p4 = scmp.lt.s32.totalorder %s17_s10, %s17_s10 }
   0xb   :  { %p233_p3 = scmp.ne.s32.totalorder %s17_s10, %s232_s20  ;;  %p238_p5 = scmp.lt.s32.totalorder %s232_s20, %s232_s20 }
   0xd   :  { %p239_p6 = por %p238_p5, %p237_p4 }
   0xf   :  { %p240_p7 = pnand %p239_p6, %p233_p3 }
  0x11   :  { %243 = shalt.err (!%p240_p7)
}
  0x12   :  { %19 = dma.hbm_to_vmem [thread:$0]  %s385_s0, 256, %s17_s10, [#allocation3]  }
  0x13   :  { %s244_s25 = scalar_lea.hbm %s386_s1, 256 }
  0x14   :  { %p245_p8 = scmp.ne.s32.totalorder %s386_s1, %s244_s25  ;;  %p248_p9 = scmp.lt.u32.totalorder %s244_s25, %s386_s1 }
  0x16   :  { %p250_p10 = pnand %p248_p9, %p245_p8 }
  0x18   :  { %253 = shalt.err (!%p250_p10)
}
  0x19   :  { %s254_s30 = scalar_lea.vmem %s27_s12, 256  ;;  %p259_p12 = scmp.lt.s32.totalorder %s27_s12, %s27_s12 }
  0x1a   :  { %p255_p11 = scmp.ne.s32.totalorder %s27_s12, %s254_s30  ;;  %p260_p13 = scmp.lt.s32.totalorder %s254_s30, %s254_s30 }
  0x1c   :  { %p261_p0 = por %p260_p13, %p259_p12 }
  0x1e   :  { %p262_p1 = pnand %p261_p0, %p255_p11 }
  0x20   :  { %265 = shalt.err (!%p262_p1)
}
  0x21   :  { %29 = dma.hbm_to_vmem [thread:$0]  %s386_s1, 256, %s27_s12, [#allocation6]  }
  0x22   :  { %288 = dma.done.wait [#allocation3], 256  }
  0x23   :  { %289 = vsyncadd [#allocation3], 4294967040 }
  0x24   :  { %290 = dma.done.wait [#allocation6], 256  }
  0x25   :  { %291 = vsyncadd [#allocation6], 4294967040  ;;  %v42_v0 = vlaneseq  ;;  %v36_v6 = vld [vmem:[#allocation2] sm:$0xff]  ;;  %v37_v7 = vld [vmem:[#allocation2 + $0x8] sm:$0xff]  ;;  %v296_v31 = vmov 0   ;;  %s297_s1 = smov [#allocation7]  }
  0x26   :  { %v337_v8 = vld [vmem:[#allocation5] sm:$0xff]  ;;  %v339_v9 = vld [vmem:[#allocation5 + $0x8] sm:$0xff]  ;;  %vm39_vm0 = vcmp.gt.f32.partialorder %v37_v7, 0.5  ;;  %vm38_vm1 = vcmp.gt.f32.partialorder %v36_v6, 0.5  ;;  %s194_s4 = sshll.u32 %s297_s1, 4  ;;  %s195_s4 = int_to_ptr.vmem [resolvable:$true] %s194_s4 }
  0x27   :  { %v43_v1 = vshrl.u32 %v42_v0, 7  ;;  %v95_v32 = vsel %vm39_vm0, 1, %v296_v31  ;;  %v94_v33 = vsel %vm38_vm1, 1, %v296_v31  ;;  %s266_s5 = scalar_lea.vmem %s195_s4, 256  ;;  %p271_p3 = scmp.lt.s32.totalorder %s195_s4, %s195_s4 }
  0x28   :  { %p267_p2 = scmp.ne.s32.totalorder %s195_s4, %s266_s5  ;;  %p272_p4 = scmp.lt.s32.totalorder %s266_s5, %s266_s5 }
  0x29   :  { %v70_v2 = vsub.s32 2, %v43_v1  ;;  %v44_v3 = vsub.s32 0, %v43_v1  ;;  %v83_v4 = vsub.s32 3, %v43_v1  ;;  %v57_v5 = vsub.s32 1, %v43_v1 }
  0x2a   :  { %v98_v30 = vsub.s32 5, %v43_v1  ;;  %v112_v34 = vsub.s32 4, %v43_v1  ;;  %v124_v38 = vsub.s32 6, %v43_v1  ;;  %p273_p5 = por %p272_p4, %p271_p3 }
  0x2b   :  { %v341_v10 = vrot.slane %v36_v6, %v70_v2  ;;  %v343_v11 = vrot.slane %v37_v7, %v70_v2  ;;  %v45_v12 = vrot.slane %v36_v6, %v44_v3  ;;  %v49_v13 = vrot.slane %v37_v7, %v44_v3 }
  0x2c   :  { %v84_v14 = vrot.slane %v36_v6, %v83_v4  ;;  %v88_v15 = vrot.slane %v37_v7, %v83_v4  ;;  %v58_v16 = vrot.slane %v36_v6, %v57_v5  ;;  %v62_v17 = vrot.slane %v37_v7, %v57_v5  ;;  %p274_p6 = pnand %p273_p5, %p267_p2 }
  0x2d   :  { %v76_v18 = vmul.f32 %v341_v10, %v337_v8  ;;  %v77_v19 = vmul.f32 %v343_v11, %v339_v9  ;;  %v50_v20 = vmul.f32 %v45_v12, %v337_v8  ;;  %v51_v21 = vmul.f32 %v49_v13, %v339_v9 }
  0x2e   :  { %v89_v22 = vmul.f32 %v84_v14, %v337_v8  ;;  %v90_v23 = vmul.f32 %v88_v15, %v339_v9  ;;  %v63_v24 = vmul.f32 %v58_v16, %v337_v8  ;;  %v64_v25 = vmul.f32 %v62_v17, %v339_v9 }
  0x2f   :  { %v78_v26 = vadd.f32 %v77_v19, %v76_v18  ;;  %v52_v27 = vadd.f32 %v51_v21, %v50_v20  ;;  %v103_v35 = vrot.slane %v95_v32, %v98_v30  ;;  %v99_v36 = vrot.slane %v94_v33, %v98_v30 }
  0x30   :  { %v91_v28 = vadd.f32 %v90_v23, %v89_v22  ;;  %v65_v29 = vadd.f32 %v64_v25, %v63_v24  ;;  %v117_v37 = vrot.slane %v95_v32, %v112_v34  ;;  %v113_v39 = vrot.slane %v94_v33, %v112_v34 }
  0x31   :  { %79 = vadd.xlane.f32.xlu1 %v78_v26  ;;  %53 = vadd.xlane.f32.xlu0 %v52_v27  ;;  %v125_v40 = vrot.slane %v36_v6, %v124_v38  ;;  %v129_v41 = vrot.slane %v37_v7, %v124_v38  ;;  %vm105_vm2 = vcmp.eq.s32.totalorder %v103_v35, 1  ;;  %vm104_vm3 = vcmp.eq.s32.totalorder %v99_v36, 1 }
  0x32   :  { %vm119_vm4 = vcmp.eq.s32.totalorder %v117_v37, 1  ;;  %vm118_vm5 = vcmp.eq.s32.totalorder %v113_v39, 1 }
  0x35   :  { %92 = vadd.xlane.f32.xlu1 %v91_v28  ;;  %66 = vadd.xlane.f32.xlu0 %v65_v29 }
  0xbe   :  { %v80_v42 = vpop.xlane.xlu1 %79  ;;  %v54_v43 = vpop.xlane.xlu0 %53 }
  0xc2   :  { %v93_v44 = vpop.xlane.xlu1 %92  ;;  %v67_v45 = vpop.xlane.xlu0 %66 }
  0xc3   :  { %v108_v46 = vsel %vm104_vm3, %v80_v42, %v93_v44  ;;  %v109_v47 = vsel %vm105_vm2, %v80_v42, %v93_v44  ;;  %v106_v48 = vsel %vm104_vm3, %v54_v43, %v67_v45  ;;  %v107_v49 = vsel %vm105_vm2, %v54_v43, %v67_v45 }
  0xc4   :  { %v120_v50 = vsel %vm118_vm5, %v106_v48, %v108_v46  ;;  %v121_v51 = vsel %vm119_vm4, %v107_v49, %v109_v47 }
  0xc5   :  { %v130_v52 = vmul.f32 %v125_v40, %v120_v50  ;;  %v131_v53 = vmul.f32 %v129_v41, %v121_v51 }
  0xc7   :  { %v132_v54 = vsub.f32 %v337_v8, %v130_v52  ;;  %v133_v55 = vsub.f32 %v339_v9, %v131_v53 }
  0xc9   :  { %v134_v56 = vmul.f32 %v132_v54, %v132_v54  ;;  %v135_v57 = vmul.f32 %v133_v55, %v133_v55 }
  0xcb   :  { %v141_v58 = vmul.f32 %v134_v56, %v58_v16  ;;  %v142_v59 = vmul.f32 %v135_v57, %v62_v17  ;;  %v136_v60 = vmul.f32 %v134_v56, %v45_v12  ;;  %v137_v61 = vmul.f32 %v135_v57, %v49_v13 }
  0xcc   :  { %v151_v62 = vmul.f32 %v134_v56, %v84_v14  ;;  %v152_v63 = vmul.f32 %v135_v57, %v88_v15  ;;  %v146_v2 = vmul.f32 %v134_v56, %v341_v10  ;;  %v147_v3 = vmul.f32 %v135_v57, %v343_v11 }
  0xcd   :  { %v143_v0 = vadd.f32 %v142_v59, %v141_v58  ;;  %v138_v1 = vadd.f32 %v137_v61, %v136_v60 }
  0xce   :  { %v153_v4 = vadd.f32 %v152_v63, %v151_v62  ;;  %v148_v5 = vadd.f32 %v147_v3, %v146_v2 }
  0xcf   :  { %144 = vadd.xlane.f32.xlu1 %v143_v0  ;;  %139 = vadd.xlane.f32.xlu0 %v138_v1 }
  0xd3   :  { %154 = vadd.xlane.f32.xlu1 %v153_v4  ;;  %149 = vadd.xlane.f32.xlu0 %v148_v5 }
 0x15c   :  { %v145_v6 = vpop.xlane.xlu1 %144  ;;  %v140_v7 = vpop.xlane.xlu0 %139 }
 0x15d   :  { %v156_v12 = vsel %vm104_vm3, %v140_v7, %v145_v6  ;;  %v157_v13 = vsel %vm105_vm2, %v140_v7, %v145_v6 }
 0x160   :  { %v155_v16 = vpop.xlane.xlu1 %154  ;;  %v150_v17 = vpop.xlane.xlu0 %149 }
 0x161   :  { %v158_v14 = vsel %vm104_vm3, %v150_v17, %v155_v16  ;;  %v159_v10 = vsel %vm105_vm2, %v150_v17, %v155_v16 }
 0x162   :  { %v160_v11 = vsel %vm118_vm5, %v156_v12, %v158_v14  ;;  %v161_v15 = vsel %vm119_vm4, %v157_v13, %v159_v10 }
 0x163   :  { %v162_v18 = vmul.f32 0.06349207, %v160_v11  ;;  %v163_v19 = vmul.f32 0.06349207, %v161_v15 }
 0x165   :  { %v164_v20 = vadd.f32 0.0004, %v162_v18  ;;  %v165_v21 = vadd.f32 0.0004, %v163_v19 }
 0x167   :  { %210 = vrcp.f32 %v164_v20 }
 0x168   :  { %212 = vrcp.f32 %v165_v21 }
 0x171   :  { %v211_v22 = vpop.eup %210 }
 0x172   :  { %v213_v23 = vpop.eup %212  ;;  %v167_v24 = vmul.f32 %v211_v22, %v134_v56 }
 0x173   :  { %v169_v25 = vmul.f32 %v213_v23, %v135_v57 }
 0x174   :  { %v170_v26 = vadd.f32 0.5, %v167_v24 }
 0x175   :  { %v171_v27 = vadd.f32 0.5, %v169_v25 }
 0x176   :  { %v204_v28 = vmul.f32 -1.442695, %v170_v26 }
 0x177   :  { %v205_v29 = vmul.f32 -1.442695, %v171_v27 }
 0x178   :  { %214 = vpow2.f32 %v204_v28 }
 0x179   :  { %216 = vpow2.f32 %v205_v29 }
 0x182   :  { %v215_v30 = vpop.eup %214 }
 0x183   :  { %v217_v31 = vpop.eup %216  ;;  %v178_v32 = vadd.f32 1.0, %v215_v30 }
 0x184   :  { %v179_v33 = vadd.f32 1.0, %v217_v31 }
 0x185   :  { %218 = vrcp.f32 %v178_v32 }
 0x186   :  { %220 = vrcp.f32 %v179_v33 }
 0x18f   :  { %v219_v34 = vpop.eup %218 }
 0x190   :  { %v221_v35 = vpop.eup %220  ;;  %v184_v36 = vmul.f32 %v219_v34, %v337_v8 }
 0x191   :  { %v185_v37 = vmul.f32 %v221_v35, %v339_v9 }
 0x192   :  { %186 = vst [vmem:[#allocation7] sm:$0xff] %v184_v36 }
 0x193   :  { %187 = vst [vmem:[#allocation7 + $0x8] sm:$0xff] %v185_v37 }
 0x194   :  { %277 = shalt.err (!%p274_p6)
}
 0x195   :  { %s278_s8 = scalar_lea.hbm %s387_s2, 256 }
 0x196   :  { %p279_p7 = scmp.ne.s32.totalorder %s387_s2, %s278_s8  ;;  %p282_p8 = scmp.lt.u32.totalorder %s278_s8, %s387_s2 }
 0x198   :  { %p284_p9 = pnand %p282_p8, %p279_p7 }
 0x19a   :  { %287 = shalt.err (!%p284_p9)
}
 0x19b   :  { %197 = dma.vmem_to_hbm [thread:$0]  %s195_s4, 256, %s387_s2, [#allocation4]  }
 0x19c   :  { %292 = dma.done.wait [#allocation4], 256  }
 0x19d   :  { %293 = vsyncadd [#allocation4], 4294967040 }
 0x19e   :  { %201 = vsyncpa [#allocation3], 1 }
 0x19f   :  { %202 = vsyncpa [#allocation6], 1 }
 0x1a0   :  { %203 = vsyncpa [#allocation4], 1 }

</bundles_post_ra>
